<compile_context>
chip_gen: v5e
topology: v5e:2x2
jax: 0.10.0
libtpu: 0.0.40
codegen_flags: <defaults>
</compile_context>

<pallas_src>
import functools

import jax
import jax.numpy as jnp
from jax import lax
from jax.experimental import pallas as pl
from jax.experimental.pallas import tpu as pltpu

EPS = 1e-5  # nn.LayerNorm default eps


def _pick_row_tile(rows):
    """Largest tile (multiple of 8) that divides rows, else the full extent."""
    for tm in (1024, 512, 256, 128, 64, 32, 16, 8):
        if rows % tm == 0:
            return tm
    return rows  # full extent (satisfies the (8,128) rule by equality)


def _sublayer_connection_kernel(seed_ref,                       # scalar prefetch (SMEM)
                                x_ref, gamma_ref, beta_ref, w_ref, b_ref,
                                o_ref,
                                *, dropout_p, tm):
    x = x_ref[...].astype(jnp.float32)                          # (TM, H)

    # ---- LayerNorm over last dim (pre-norm), stats in fp32 ----
    mean = jnp.mean(x, axis=-1, keepdims=True)
    var = jnp.mean((x - mean) * (x - mean), axis=-1, keepdims=True)
    xn = (x - mean) * lax.rsqrt(var + EPS)
    y = xn * gamma_ref[...] + beta_ref[...]                     # params already fp32

    # ---- sublayer: dense (hidden -> hidden) on the MXU ----
    # bf16 inputs, fp32 accumulation.
    z = jnp.dot(y.astype(jnp.bfloat16), w_ref[...],
                preferred_element_type=jnp.float32)
    z = z + b_ref[...]

    # ---- dropout (training semantics, inverted scaling) ----
    if dropout_p > 0.0:
        shape = z.shape
        row0 = (pl.program_id(0) * tm).astype(jnp.uint32)
        r = lax.broadcasted_iota(jnp.uint32, shape, 0) + row0   # global row index
        c = lax.broadcasted_iota(jnp.uint32, shape, 1)          # column index
        s = seed_ref[0].astype(jnp.uint32)
        # counter-based hash (splitmix32-style finalizer), pure uint32 VPU ops
        h = (r * jnp.uint32(0x9E3779B1)) ^ (c * jnp.uint32(0x85EBCA77)) \
            ^ (s * jnp.uint32(0xC2B2AE3D))
        h = h ^ (h >> jnp.uint32(16))
        h = h * jnp.uint32(0x7FEB352D)
        h = h ^ (h >> jnp.uint32(15))
        h = h * jnp.uint32(0x846CA68B)
        h = h ^ (h >> jnp.uint32(16))
        thresh = jnp.uint32(min(int(dropout_p * 4294967296.0), 4294967295))
        keep = h >= thresh                                       # P(keep) = 1 - p
        z = jnp.where(keep, z * jnp.float32(1.0 / (1.0 - dropout_p)),
                      jnp.float32(0.0))

    # ---- residual connection with the *original* x ----
    o_ref[...] = (x + z).astype(o_ref.dtype)


def sublayer_connection(x, gamma, beta, w, b, *, dropout_p=0.1, seed=0):
    """x: (rows, hidden); gamma/beta/b: (1, hidden); w: (hidden, hidden)."""
    rows, hidden = x.shape
    tm = _pick_row_tile(rows)
    grid = (rows // tm,) if rows % tm == 0 else (pl.cdiv(rows, tm),)

    seed_arr = jnp.array([seed], dtype=jnp.int32)
    gamma32 = gamma.astype(jnp.float32)
    beta32 = beta.astype(jnp.float32)
    b32 = b.astype(jnp.float32)
    w16 = w.astype(jnp.bfloat16)   # half the weight DMA / VMEM footprint
    # TODO(synk): for very large hidden (e.g. 4096 on v7x's 64 MiB VMEM), add an
    # N-tiling grid axis over w's output columns instead of keeping w resident.

    kernel = functools.partial(_sublayer_connection_kernel,
                               dropout_p=float(dropout_p), tm=tm)

    itemsize = jnp.dtype(x.dtype).itemsize
    # double-buffered x & out tiles + resident bf16 weight + small params
    vmem_est = (2 * tm * hidden * itemsize
                + 2 * tm * hidden * itemsize
                + 2 * hidden * hidden * 2
                + 2 * 3 * hidden * 4)
    vmem_limit = int(min(max(int(vmem_est * 1.5) + (1 << 20), 4 << 20), 64 << 20))

    cost = pl.CostEstimate(
        flops=2 * rows * hidden * hidden + 12 * rows * hidden,
        transcendentals=rows,
        bytes_accessed=2 * rows * hidden * itemsize + hidden * hidden * 2
                       + 3 * hidden * 4)

    return pl.pallas_call(
        kernel,
        out_shape=jax.ShapeDtypeStruct((rows, hidden), x.dtype),
        grid_spec=pltpu.PrefetchScalarGridSpec(
            num_scalar_prefetch=1,
            grid=grid,
            in_specs=[
                pl.BlockSpec((tm, hidden), lambda i, seed: (i, 0)),      # x (tiled)
                pl.BlockSpec((1, hidden), lambda i, seed: (0, 0)),       # gamma
                pl.BlockSpec((1, hidden), lambda i, seed: (0, 0)),       # beta
                pl.BlockSpec((hidden, hidden), lambda i, seed: (0, 0)),  # w (bf16)
                pl.BlockSpec((1, hidden), lambda i, seed: (0, 0)),       # b
            ],
            out_specs=pl.BlockSpec((tm, hidden), lambda i, seed: (i, 0)),
        ),
        compiler_params=pltpu.CompilerParams(
            dimension_semantics=("parallel",),
            vmem_limit_bytes=vmem_limit),
        cost_estimate=cost,
    )(seed_arr, x, gamma32, beta32, w16, b32)


if __name__ == "__main__":
    batch, seq, hidden = 2, 8, 128
    dropout_p = 0.1

    key = jax.random.PRNGKey(0)
    kx, kw, kb = jax.random.split(key, 3)

    x = jax.random.normal(kx, (batch, seq, hidden), dtype=jnp.float32)

    # LayerNorm params (PyTorch default init: gamma=1, beta=0)
    gamma = jnp.ones((1, hidden), dtype=jnp.float32)
    beta = jnp.zeros((1, hidden), dtype=jnp.float32)

    # Deterministic sublayer (dense hidden -> hidden) params
    w = jax.random.normal(kw, (hidden, hidden), dtype=jnp.float32) * (hidden ** -0.5)
    b = jax.random.normal(kb, (1, hidden), dtype=jnp.float32) * 0.02

    x2d = x.reshape(batch * seq, hidden)

    # Run once with dropout enabled (training semantics)
    out2d = sublayer_connection(x2d, gamma, beta, w, b,
                                dropout_p=dropout_p, seed=0)
    out = out2d.reshape(batch, seq, hidden)
    jax.block_until_ready(out)

    # Sanity check against a pure-JAX reference with dropout disabled.
    # The reference mirrors the kernel's compute (bf16 matmul inputs, fp32 accum).
    out_nodrop = sublayer_connection(x2d, gamma, beta, w, b,
                                     dropout_p=0.0, seed=0)
    mean = jnp.mean(x2d, axis=-1, keepdims=True)
    var = jnp.mean((x2d - mean) ** 2, axis=-1, keepdims=True)
    xn = (x2d - mean) * jax.lax.rsqrt(var + EPS) * gamma + beta
    z = jnp.dot(xn.astype(jnp.bfloat16), w.astype(jnp.bfloat16),
                preferred_element_type=jnp.float32) + b
    ref = x2d + z
    assert jnp.allclose(out_nodrop, ref, atol=2e-3, rtol=2e-3), "mismatch vs reference"
    assert out.shape == x.shape and bool(jnp.all(jnp.isfinite(out)))

    print("KERNEL_OK")
</pallas_src>

<mosaic_0001>
module attributes {stable_mosaic.version = 11 : i64} {
  func.func @_sublayer_connection_kernel(%arg0: i32, %arg1: memref<1xi32, #tpu.memory_space<smem>>, %arg2: memref<16x128xf32, #tpu.memory_space<vmem>>, %arg3: memref<1x128xf32, #tpu.memory_space<vmem>>, %arg4: memref<1x128xf32, #tpu.memory_space<vmem>>, %arg5: memref<128x128xbf16, #tpu.memory_space<vmem>>, %arg6: memref<1x128xf32, #tpu.memory_space<vmem>>, %arg7: memref<16x128xf32, #tpu.memory_space<vmem>>) attributes {dimension_semantics = [#tpu.dimension_semantics<parallel>], iteration_bounds = array<i64: 1>, scalar_prefetch = 1 : i64, scratch_operands = 0 : i64, tpu.core_type = #tpu.core_type<tc>, window_params = [{transform_indices = @transform_0, window_bounds = array<i64: 16, 128>}, {pipeline_mode = #tpu.pipeline_mode<synchronous>, transform_indices = @transform_1, window_bounds = array<i64: 1, 128>}, {pipeline_mode = #tpu.pipeline_mode<synchronous>, transform_indices = @transform_2, window_bounds = array<i64: 1, 128>}, {pipeline_mode = #tpu.pipeline_mode<synchronous>, transform_indices = @transform_3, window_bounds = array<i64: 128, 128>}, {pipeline_mode = #tpu.pipeline_mode<synchronous>, transform_indices = @transform_4, window_bounds = array<i64: 1, 128>}, {transform_indices = @transform_5, window_bounds = array<i64: 16, 128>}]} {
    %c0 = arith.constant 0 : index
    %c0_0 = arith.constant 0 : index
    %0 = vector.load %arg2[%c0, %c0_0] : memref<16x128xf32, #tpu.memory_space<vmem>>, vector<16x128xf32>
    %cst = arith.constant dense<0.000000e+00> : vector<16xf32>
    %1 = vector.multi_reduction <add>, %0, %cst [1] : vector<16x128xf32> to vector<16xf32>
    %2 = vector.shape_cast %1 : vector<16xf32> to vector<16x1xf32>
    %cst_1 = arith.constant 1.280000e+02 : f32
    %3 = vector.broadcast %cst_1 : f32 to vector<16x1xf32>
    %4 = arith.divf %2, %3 : vector<16x1xf32>
    %5 = vector.broadcast %4 : vector<16x1xf32> to vector<16x128xf32>
    %6 = arith.subf %0, %5 : vector<16x128xf32>
    %7 = vector.broadcast %4 : vector<16x1xf32> to vector<16x128xf32>
    %8 = arith.subf %0, %7 : vector<16x128xf32>
    %9 = arith.mulf %6, %8 : vector<16x128xf32>
    %cst_2 = arith.constant dense<0.000000e+00> : vector<16xf32>
    %10 = vector.multi_reduction <add>, %9, %cst_2 [1] : vector<16x128xf32> to vector<16xf32>
    %11 = vector.shape_cast %10 : vector<16xf32> to vector<16x1xf32>
    %cst_3 = arith.constant 1.280000e+02 : f32
    %12 = vector.broadcast %cst_3 : f32 to vector<16x1xf32>
    %13 = arith.divf %11, %12 : vector<16x1xf32>
    %14 = vector.broadcast %4 : vector<16x1xf32> to vector<16x128xf32>
    %15 = arith.subf %0, %14 : vector<16x128xf32>
    %cst_4 = arith.constant 9.99999974E-6 : f32
    %16 = vector.broadcast %cst_4 : f32 to vector<16x1xf32>
    %17 = arith.addf %13, %16 : vector<16x1xf32>
    %18 = math.rsqrt %17 : vector<16x1xf32>
    %19 = vector.broadcast %18 : vector<16x1xf32> to vector<16x128xf32>
    %20 = arith.mulf %15, %19 : vector<16x128xf32>
    %c0_5 = arith.constant 0 : index
    %c0_6 = arith.constant 0 : index
    %21 = vector.load %arg3[%c0_5, %c0_6] : memref<1x128xf32, #tpu.memory_space<vmem>>, vector<1x128xf32>
    %22 = vector.broadcast %21 : vector<1x128xf32> to vector<16x128xf32>
    %23 = arith.mulf %20, %22 : vector<16x128xf32>
    %c0_7 = arith.constant 0 : index
    %c0_8 = arith.constant 0 : index
    %24 = vector.load %arg4[%c0_7, %c0_8] : memref<1x128xf32, #tpu.memory_space<vmem>>, vector<1x128xf32>
    %25 = vector.broadcast %24 : vector<1x128xf32> to vector<16x128xf32>
    %26 = arith.addf %23, %25 : vector<16x128xf32>
    %27 = arith.truncf %26 : vector<16x128xf32> to vector<16x128xbf16>
    %c0_9 = arith.constant 0 : index
    %c0_10 = arith.constant 0 : index
    %28 = vector.load %arg5[%c0_9, %c0_10] : memref<128x128xbf16, #tpu.memory_space<vmem>>, vector<128x128xbf16>
    %cst_11 = arith.constant dense<0.000000e+00> : vector<16x128xf32>
    %29 = tpu.matmul %27, %28, %cst_11 {dimension_numbers = #tpu.dot_dimension_numbers<[1], [0], [0], [1], [0, 0, 1, 1], [], []>} : vector<16x128xbf16>, vector<128x128xbf16>, vector<16x128xf32> -> vector<16x128xf32>
    %c0_12 = arith.constant 0 : index
    %c0_13 = arith.constant 0 : index
    %30 = vector.load %arg6[%c0_12, %c0_13] : memref<1x128xf32, #tpu.memory_space<vmem>>, vector<1x128xf32>
    %31 = vector.broadcast %30 : vector<1x128xf32> to vector<16x128xf32>
    %32 = arith.addf %29, %31 : vector<16x128xf32>
    %c16_i32 = arith.constant 16 : i32
    %33 = arith.muli %arg0, %c16_i32 : i32
    %34 = tpu.iota {dimensions = array<i32: 0>} : vector<16x128xi32>
    %35 = vector.broadcast %33 : i32 to vector<16x128xi32>
    %36 = arith.addi %34, %35 : vector<16x128xi32>
    %37 = tpu.iota {dimensions = array<i32: 1>} : vector<16x128xi32>
    %c0_14 = arith.constant 0 : index
    %38 = memref.load %arg1[%c0_14] : memref<1xi32, #tpu.memory_space<smem>>
    %c-1640531535_i32 = arith.constant -1640531535 : i32
    %39 = vector.broadcast %c-1640531535_i32 : i32 to vector<16x128xi32>
    %40 = arith.muli %36, %39 : vector<16x128xi32>
    %c-2048144777_i32 = arith.constant -2048144777 : i32
    %41 = vector.broadcast %c-2048144777_i32 : i32 to vector<16x128xi32>
    %42 = arith.muli %37, %41 : vector<16x128xi32>
    %43 = arith.xori %40, %42 : vector<16x128xi32>
    %c-1028477379_i32 = arith.constant -1028477379 : i32
    %44 = arith.muli %38, %c-1028477379_i32 : i32
    %45 = vector.broadcast %44 : i32 to vector<16x128xi32>
    %46 = arith.xori %43, %45 : vector<16x128xi32>
    %c16_i32_15 = arith.constant 16 : i32
    %47 = vector.broadcast %c16_i32_15 : i32 to vector<16x128xi32>
    %48 = arith.shrui %46, %47 : vector<16x128xi32>
    %49 = arith.xori %46, %48 : vector<16x128xi32>
    %c2146121005_i32 = arith.constant 2146121005 : i32
    %50 = vector.broadcast %c2146121005_i32 : i32 to vector<16x128xi32>
    %51 = arith.muli %49, %50 : vector<16x128xi32>
    %c15_i32 = arith.constant 15 : i32
    %52 = vector.broadcast %c15_i32 : i32 to vector<16x128xi32>
    %53 = arith.shrui %51, %52 : vector<16x128xi32>
    %54 = arith.xori %51, %53 : vector<16x128xi32>
    %c-2073254261_i32 = arith.constant -2073254261 : i32
    %55 = vector.broadcast %c-2073254261_i32 : i32 to vector<16x128xi32>
    %56 = arith.muli %54, %55 : vector<16x128xi32>
    %c16_i32_16 = arith.constant 16 : i32
    %57 = vector.broadcast %c16_i32_16 : i32 to vector<16x128xi32>
    %58 = arith.shrui %56, %57 : vector<16x128xi32>
    %59 = arith.xori %56, %58 : vector<16x128xi32>
    %c429496729_i32 = arith.constant 429496729 : i32
    %60 = vector.broadcast %c429496729_i32 : i32 to vector<16x128xi32>
    %61 = arith.cmpi uge, %59, %60 : vector<16x128xi32>
    %cst_17 = arith.constant 1.11111116 : f32
    %62 = vector.broadcast %cst_17 : f32 to vector<16x128xf32>
    %63 = arith.mulf %32, %62 : vector<16x128xf32>
    %cst_18 = arith.constant 0.000000e+00 : f32
    %64 = vector.broadcast %cst_18 : f32 to vector<16x128xf32>
    %65 = arith.select %61, %63, %64 : vector<16x128xi1>, vector<16x128xf32>
    %66 = arith.addf %0, %65 : vector<16x128xf32>
    %c0_19 = arith.constant 0 : index
    %c0_20 = arith.constant 0 : index
    %67 = vector.load %arg7[%c0_19, %c0_20] : memref<16x128xf32, #tpu.memory_space<vmem>>, vector<16x128xf32>
    tpu.vector_store %arg7[%c0_19, %c0_20], %66 {strides = array<i32>} : memref<16x128xf32, #tpu.memory_space<vmem>>, vector<16x128xf32>,
    return
  }
  func.func @transform_0(%arg0: i32, %arg1: memref<1xi32, #tpu.memory_space<smem>>) -> (i32, i32) {
    %c0_i32 = arith.constant 0 : i32
    %c0_i32_0 = arith.constant 0 : i32
    return %arg0, %c0_i32 : i32, i32
  }
  func.func @transform_1(%arg0: i32, %arg1: memref<1xi32, #tpu.memory_space<smem>>) -> (i32, i32) {
    %c0_i32 = arith.constant 0 : i32
    %c0_i32_0 = arith.constant 0 : i32
    %c0_i32_1 = arith.constant 0 : i32
    return %c0_i32, %c0_i32_0 : i32, i32
  }
  func.func @transform_2(%arg0: i32, %arg1: memref<1xi32, #tpu.memory_space<smem>>) -> (i32, i32) {
    %c0_i32 = arith.constant 0 : i32
    %c0_i32_0 = arith.constant 0 : i32
    %c0_i32_1 = arith.constant 0 : i32
    return %c0_i32, %c0_i32_0 : i32, i32
  }
  func.func @transform_3(%arg0: i32, %arg1: memref<1xi32, #tpu.memory_space<smem>>) -> (i32, i32) {
    %c0_i32 = arith.constant 0 : i32
    %c0_i32_0 = arith.constant 0 : i32
    %c0_i32_1 = arith.constant 0 : i32
    return %c0_i32, %c0_i32_0 : i32, i32
  }
  func.func @transform_4(%arg0: i32, %arg1: memref<1xi32, #tpu.memory_space<smem>>) -> (i32, i32) {
    %c0_i32 = arith.constant 0 : i32
    %c0_i32_0 = arith.constant 0 : i32
    %c0_i32_1 = arith.constant 0 : i32
    return %c0_i32, %c0_i32_0 : i32, i32
  }
  func.func @transform_5(%arg0: i32, %arg1: memref<1xi32, #tpu.memory_space<smem>>) -> (i32, i32) {
    %c0_i32 = arith.constant 0 : i32
    %c0_i32_0 = arith.constant 0 : i32
    return %arg0, %c0_i32 : i32, i32
  }
}

</mosaic_0001>

<bundles_post_ra>
// kernel: tpu_custom_call.1
= control target key start
LH: loop header
LB: loop body
LE: loop exit
PB: predicated region body
PF: predicated region fallthrough
CT: control target
= control target key end

     0   :  { %12 = vsyncpa [#allocation5], 0  ;;  %s485_s0 = inlined_call_operand.<no memory space> [shape: s32[1], index: 0, kind: input, shape index: {}]   ;;  %s486_s1 = inlined_call_operand.hbm [shape: f32[16,128], index: 1, kind: input, shape index: {}]   ;;  %s487_s2 = inlined_call_operand.vmem [shape: f32[1,128], index: 2, kind: input, shape index: {}]   ;;  %s488_s3 = inlined_call_operand.vmem [shape: f32[1,128], index: 3, kind: input, shape index: {}]   ;;  %s489_s4 = inlined_call_operand.hbm [shape: bf16[128,128], index: 4, kind: input, shape index: {}]   ;;  %s490_s5 = inlined_call_operand.vmem [shape: f32[1,128], index: 5, kind: input, shape index: {}]   ;;  %s491_s6 = inlined_call_operand.hbm [shape: f32[16,128], index: 6, kind: output, shape index: {}]  }
   0x1   :  { %13 = vsyncpa [#allocation8], 0 }
   0x2   :  { %14 = vsyncpa [#allocation6], 0  ;;  %s19_s23 = sshll.u32 %s486_s1, 4  ;;  %s405_s24 = smov [#allocation4]   ;;  %s20_s23 = int_to_ptr.hbm [resolvable:$true] %s19_s23 }
   0x3   :  { %s21_s25 = sshll.u32 %s405_s24, 4  ;;  %s36_s28 = sshll.u32 %s489_s4, 4  ;;  %s22_s25 = int_to_ptr.vmem [resolvable:$true] %s21_s25  ;;  %s37_s28 = int_to_ptr.hbm [resolvable:$true] %s36_s28 }
   0x4   :  { %s406_s29 = smov 128   ;;  %s407_s30 = smov 8  }
   0x5   :  { %27 = dma.hbm_to_vmem [thread:$0]  %s20_s23, 256, %s22_s25, [#allocation5], %s406_s29, %s406_s29, %s407_s30  }
   0x6   :  { %s408_s7 = smov [#allocation7]   ;;  %s409_s9 = smov 64  }
   0x7   :  { %s38_s8 = sshll.u32 %s408_s7, 4  ;;  %s410_s1 = smov 4   ;;  %s39_s8 = int_to_ptr.vmem [resolvable:$true] %s38_s8 }
   0x8   :  { %44 = dma.hbm_to_vmem [thread:$0]  %s37_s28, 1024, %s39_s8, [#allocation8], %s409_s9, %s409_s9, %s410_s1  }
   0x9   :  { %399 = dma.done.wait [#allocation5], 256  }
   0xa   :  { %400 = vsyncadd [#allocation5], 4294967040 }
   0xb   :  { %401 = dma.done.wait [#allocation8], 1024  }
   0xc   :  { %402 = vsyncadd [#allocation8], 4294966272  ;;  %v457_v0 = vld [vmem:[#allocation4] sm:$0xff]  ;;  %v460_v1 = vld [vmem:[#allocation4 + $0x8] sm:$0xff]  ;;  %v411_v2 = vmov 128.0   ;;  %v200_v54 = vlaneseq  ;;  %s412_s15 = smov [#allocation9]  }
   0xd   :  { %57 = vadd.xlane.f32.xlu0 %v457_v0  ;;  %321 = vrcp.f32 %v411_v2  ;;  %v309_v17 = vld [vmem:[#allocation7 + $0x38] sm:$0xff]  ;;  %v308_v18 = vld [vmem:[#allocation7 + $0x30] sm:$0xff]  ;;  %v307_v19 = vld [vmem:[#allocation7 + $0x28] sm:$0xff]  ;;  %s214_s14 = smul.u32 3266489917, %s485_s0  ;;  %s252_s16 = sshll.u32 %s412_s15, 4  ;;  %s253_s16 = int_to_ptr.vmem [resolvable:$true] %s252_s16 }
   0xe   :  { %185 = vmatpush.bf16.msra.mxu0 %v309_v17  ;;  %v306_v20 = vld [vmem:[#allocation7 + $0x20] sm:$0xff]  ;;  %v305_v21 = vld [vmem:[#allocation7 + $0x18] sm:$0xff]  ;;  %v304_v22 = vld [vmem:[#allocation7 + $0x10] sm:$0xff]  ;;  %v201_v55 = vshrl.u32 %v200_v54, 7  ;;  %v207_v56 = vand.u32 127, %v200_v54  ;;  %s254_s18 = sshll.u32 %s491_s6, 4  ;;  %s255_s18 = int_to_ptr.hbm [resolvable:$true] %s254_s18 }
   0xf   :  { %v303_v23 = vld [vmem:[#allocation7 + $0x8] sm:$0xff]  ;;  %v302_v25 = vld [vmem:[#allocation7] sm:$0xff]  ;;  %v318_v44 = vld [vmem:[%s487_s2] ss:$0 sm:$0xff]  ;;  %v215_v61 = vstv %s214_s14 }
  0x10   :  { %v319_v49 = vld [vmem:[%s488_s3] ss:$0 sm:$0xff]  ;;  %v209_v57 = vmul.u32 2654435761, %v201_v55  ;;  %v211_v58 = vmul.u32 2246822519, %v207_v56 }
  0x11   :  { %v202_v60 = vadd.s32 8, %v201_v55 }
  0x12   :  { %186 = vmatpush.bf16.msra.mxu0 %v308_v18  ;;  %v212_v59 = vxor.u32 %v211_v58, %v209_v57  ;;  %v320_v18 = vld [vmem:[%s490_s5] ss:$0 sm:$0xff] }
  0x13   :  { %v322_v3 = vpop.eup %321  ;;  %v210_v63 = vmul.u32 2654435761, %v202_v60 }
  0x14   :  { %v62_v4 = vmul.f32 128.0, %v322_v3  ;;  %vm66_vm0 = vweird.f32 %v322_v3  ;;  %v216_v62 = vxor.u32 %v215_v61, %v212_v59 }
  0x15   :  { %59 = vadd.xlane.f32.xlu0 %v460_v1 }
  0x16   :  { %v63_v5 = vsub.f32 1.0, %v62_v4  ;;  %187 = vmatpush.bf16.msra.mxu0 %v307_v19  ;;  %v218_v2 = vshrl.u32 %v216_v62, 16 }
  0x18   :  { %v64_v6 = vmul.f32 %v322_v3, %v63_v5  ;;  %v220_v4 = vxor.u32 %v218_v2, %v216_v62 }
  0x1a   :  { %v65_v7 = vadd.f32 %v322_v3, %v64_v6  ;;  %188 = vmatpush.bf16.msra.mxu0 %v306_v20  ;;  %v222_v6 = vmul.u32 2146121005, %v220_v4 }
  0x1c   :  { %v67_v8 = vsel %vm66_vm0, %v322_v3, %v65_v7  ;;  %v213_v3 = vxor.u32 %v211_v58, %v210_v63 }
  0x1e   :  { %189 = vmatpush.bf16.msra.mxu0 %v305_v21  ;;  %v217_v5 = vxor.u32 %v215_v61, %v213_v3 }
  0x20   :  { %v219_v7 = vshrl.u32 %v217_v5, 16 }
  0x22   :  { %190 = vmatpush.bf16.msra.mxu0 %v304_v22 }
  0x26   :  { %191 = vmatpush.bf16.msra.mxu0 %v303_v23 }
  0x2a   :  { %192 = vmatpush.bf16.msra.mxu0 %v302_v25 }
  0x80   :  { %v58_v9 = vpop.xlane.xlu0 %57 }
  0x81   :  { %v68_v10 = vmul.f32 %v67_v8, %v58_v9  ;;  %v221_v9 = vxor.u32 %v219_v7, %v217_v5 }
  0x83   :  { %v70_v11 = vsub.f32 %v457_v0, %v68_v10 }
  0x85   :  { %v72_v12 = vmul.f32 %v70_v11, %v70_v11 }
  0x87   :  { %74 = vadd.xlane.f32.xlu1 %v72_v12 }
  0x88   :  { %v60_v13 = vpop.xlane.xlu0 %59 }
  0x89   :  { %v69_v14 = vmul.f32 %v67_v8, %v60_v13 }
  0x8b   :  { %v71_v15 = vsub.f32 %v460_v1, %v69_v14 }
  0x8d   :  { %v73_v16 = vmul.f32 %v71_v15, %v71_v15 }
  0x8f   :  { %76 = vadd.xlane.f32.xlu1 %v73_v16 }
  0xfa   :  { %v75_v24 = vpop.xlane.xlu1 %74 }
  0xfb   :  { %v78_v26 = vmul.f32 %v75_v24, %v67_v8 }
  0xfd   :  { %v80_v27 = vadd.f32 1e-05, %v78_v26 }
  0xff   :  { %323 = vrsqrt.f32 %v80_v27  ;;  %vm88_vm2 = vweird.f32 %v80_v27 }
 0x102   :  { %v77_v28 = vpop.xlane.xlu1 %76 }
 0x103   :  { %v79_v29 = vmul.f32 %v77_v28, %v67_v8  ;;  %v224_v8 = vshrl.u32 %v222_v6, 15 }
 0x105   :  { %v324_v30 = vpop.eup %323  ;;  %v81_v31 = vadd.f32 1e-05, %v79_v29  ;;  %v226_v10 = vxor.u32 %v224_v8, %v222_v6 }
 0x106   :  { %v83_v32 = vmul.f32 %v324_v30, %v80_v27  ;;  %vm89_vm1 = vweird.f32 %v324_v30 }
 0x107   :  { %325 = vrsqrt.f32 %v81_v31  ;;  %vm90_vm3 = vmor %vm88_vm2, %vm89_vm1  ;;  %vm98_vm5 = vweird.f32 %v81_v31  ;;  %v228_v12 = vmul.u32 2221713035, %v226_v10 }
 0x108   :  { %v84_v33 = vmul.f32 %v324_v30, %v83_v32 }
 0x109   :  { %v230_v14 = vshrl.u32 %v228_v12, 16 }
 0x10a   :  { %v85_v34 = vmul.f32 0.5, %v84_v33 }
 0x10b   :  { %v232_v16 = vxor.u32 %v230_v14, %v228_v12 }
 0x10c   :  { %v86_v35 = vsub.f32 1.5, %v85_v34 }
 0x10d   :  { %v326_v36 = vpop.eup %325  ;;  %v300_v19 = vxor.u32 2147483648, %v232_v16 }
 0x10e   :  { %v87_v37 = vmul.f32 %v324_v30, %v86_v35  ;;  %v93_v38 = vmul.f32 %v326_v36, %v81_v31  ;;  %vm99_vm4 = vweird.f32 %v326_v36 }
 0x10f   :  { %vm100_vm6 = vmor %vm98_vm5, %vm99_vm4  ;;  %vm236_vm7 = vcmp.ge.s32.totalorder %v300_v19, 2576980377 }
 0x110   :  { %v94_v39 = vmul.f32 %v326_v36, %v93_v38  ;;  %v91_v41 = vsel %vm90_vm3, %v324_v30, %v87_v37 }
 0x111   :  { %v102_v43 = vmul.f32 %v91_v41, %v70_v11  ;;  %v223_v11 = vmul.u32 2146121005, %v221_v9 }
 0x112   :  { %v95_v40 = vmul.f32 0.5, %v94_v39 }
 0x113   :  { %v108_v48 = vmul.f32 %v318_v44, %v102_v43  ;;  %v225_v13 = vshrl.u32 %v223_v11, 15 }
 0x114   :  { %v96_v42 = vsub.f32 1.5, %v95_v40 }
 0x115   :  { %v114_v51 = vadd.f32 %v319_v49, %v108_v48 }
 0x116   :  { %v97_v45 = vmul.f32 %v326_v36, %v96_v42 }
 0x118   :  { %v101_v46 = vsel %vm100_vm6, %v326_v36, %v97_v45 }
 0x119   :  { %v103_v47 = vmul.f32 %v101_v46, %v71_v15  ;;  %v227_v15 = vxor.u32 %v225_v13, %v223_v11 }
 0x11b   :  { %v109_v50 = vmul.f32 %v318_v44, %v103_v47  ;;  %v229_v17 = vmul.u32 2221713035, %v227_v15 }
 0x11d   :  { %v115_v52 = vadd.f32 %v319_v49, %v109_v50  ;;  %v231_v20 = vshrl.u32 %v229_v17, 16 }
 0x11f   :  { %v116_v53 = vpack.c.bf16 %v115_v52, %v114_v51  ;;  %v233_v23 = vxor.u32 %v231_v20, %v229_v17 }
 0x121   :  { %193 = vmatmul.bf16.vlgmr.msra.gmra.mxu0 %v116_v53  ;;  %v301_v27 = vxor.u32 2147483648, %v233_v23 }
 0x123   :  { %vm239_vm8 = vcmp.ge.s32.totalorder %v301_v27, 2576980377 }
 0x19e   :  { %v194_v21 = vpop.f32.mrf.mxu0 }
 0x19f   :  { %v195_v22 = vadd.f32 %v320_v18, %v194_v21 }
 0x1a1   :  { %v240_v24 = vmul.f32 1.1111112, %v195_v22 }
 0x1a3   :  { %v242_v25 = vsel %vm236_vm7, %v240_v24, 0.0 }
 0x1a4   :  { %v244_v26 = vadd.f32 %v242_v25, %v457_v0 }
 0x1a6   :  { %246 = vst [vmem:[#allocation9] sm:$0xff] %v244_v26  ;;  %v196_v28 = vpop.f32.mrf.mxu0 }
 0x1a7   :  { %v197_v29 = vadd.f32 %v320_v18, %v196_v28 }
 0x1a9   :  { %v241_v30 = vmul.f32 1.1111112, %v197_v29 }
 0x1ab   :  { %v243_v31 = vsel %vm239_vm8, %v241_v30, 0.0 }
 0x1ac   :  { %v245_v32 = vadd.f32 %v243_v31, %v460_v1 }
 0x1ae   :  { %247 = vst [vmem:[#allocation9 + $0x8] sm:$0xff] %v245_v32 }
 0x1af   :  { %260 = dma.vmem_to_hbm [thread:$0]  %s253_s16, 256, %s255_s18, [#allocation6], %s406_s29, %s406_s29, %s407_s30  }
 0x1b0   :  { %403 = dma.done.wait [#allocation6], 256  }
 0x1b1   :  { %404 = vsyncadd [#allocation6], 4294967040 }
 0x1b2   :  { %265 = vsyncpa [#allocation5], 1 }
 0x1b3   :  { %266 = vsyncpa [#allocation8], 1 }
 0x1b4   :  { %267 = vsyncpa [#allocation6], 1 }

</bundles_post_ra>
